<compile_context>
chip_gen: v7x
topology: tpu7x:2x2x1
jax: 0.10.0
libtpu: 0.0.40
codegen_flags: <defaults>
</compile_context>

<pallas_src>
import functools
import math

import jax
import jax.numpy as jnp
from jax.experimental import pallas as pl
from jax.experimental.pallas import tpu as pltpu

_INV_SQRT2 = 0.7071067811865475


def _row_tiling(m):
    """Pick (tile_rows, padded_rows).

    Tiles are multiples of 16 rows (bf16 sublane packing), capped at 512.
    Prefer >= 4 grid steps, accept >= 2 (keeps both v7x TensorCores fed and the
    pipeline deep); otherwise a single tile covering the (16-padded) rows.
    """
    mp16 = ((m + 15) // 16) * 16
    for min_steps in (4, 2):
        for t in (512, 256, 128, 64, 32, 16):
            if mp16 >= min_steps * t:
                mp = ((m + t - 1) // t) * t
                return t, mp
    return mp16, mp16


def _gelu(x):
    # erf-based gelu (matches PyTorch reference); multiply, not divide.
    return x * 0.5 * (1.0 + jax.lax.erf(x * _INV_SQRT2))


def _layernorm(x, g, b, eps=1e-12):
    mu = jnp.mean(x, axis=-1, keepdims=True)
    var = jnp.mean(jnp.square(x - mu), axis=-1, keepdims=True)
    return (x - mu) * jax.lax.rsqrt(var + eps) * g + b


# --------------------------------------------------------------------------
# Parameter preparation: bf16 weights (once) + attention scale folded into Q.
# --------------------------------------------------------------------------
def prepare_params(params):
    hb = params["bi_hidden"]
    nh = params["num_heads"]
    scale = 1.0 / math.sqrt(hb // nh)
    p = dict(params)
    for s in ("1", "2"):
        w = params[f"w_qkv{s}"].at[:, :hb].multiply(scale)
        b = params[f"b_qkv{s}"].at[:hb].multiply(scale)
        p[f"w_qkv{s}"] = w.astype(jnp.bfloat16)
        p[f"b_qkv{s}"] = b
    for k in ("v_bi_w", "v_int_w", "v_out_w", "t_bi_w", "t_int_w", "t_out_w"):
        p[k] = params[k].astype(jnp.bfloat16)
    return p


# --------------------------------------------------------------------------
# Kernel 1: fused linear (concatenated QKV projection), bf16 output
# --------------------------------------------------------------------------
def _linear_kernel(x_ref, w_ref, b_ref, o_ref):
    y = jnp.dot(x_ref[...].astype(jnp.bfloat16), w_ref[...],
                preferred_element_type=jnp.float32) + b_ref[...]
    o_ref[...] = y.astype(o_ref.dtype)


def fused_linear(x2d, w_bf16, b):
    """x2d:[M,K] f32, w:[K,N] bf16, b:[N] f32 -> [M,N] bf16."""
    M, K = x2d.shape
    N = w_bf16.shape[1]
    tm, mp = _row_tiling(M)
    xp = x2d if mp == M else jnp.pad(x2d, ((0, mp - M), (0, 0)))
    out = pl.pallas_call(
        _linear_kernel,
        out_shape=jax.ShapeDtypeStruct((mp, N), jnp.bfloat16),
        grid_spec=pltpu.PrefetchScalarGridSpec(
            num_scalar_prefetch=0,
            grid=(mp // tm,),
            in_specs=[
                pl.BlockSpec((tm, K), lambda i: (i, 0)),
                pl.BlockSpec((K, N), lambda i: (0, 0)),
                pl.BlockSpec((1, N), lambda i: (0, 0)),
            ],
            out_specs=pl.BlockSpec((tm, N), lambda i: (i, 0)),
        ),
        compiler_params=pltpu.CompilerParams(dimension_semantics=("parallel",)),
    )(xp, w_bf16, b.reshape(1, N))
    return out if mp == M else out[:M]


# --------------------------------------------------------------------------
# Kernel 2: per-batch bi-directional cross attention, heads sliced in-kernel
# --------------------------------------------------------------------------
def _biattn_kernel(qkv1_ref, qkv2_ref, m1_ref, m2_ref, ctx1_ref, ctx2_ref,
                   *, nh, hd, hb):
    qkv1 = qkv1_ref[0]      # [S1, 3*Hb] bf16 (stream 1 / visual)
    qkv2 = qkv2_ref[0]      # [S2, 3*Hb] bf16 (stream 2 / text)
    mask1 = m1_ref[0]       # [1, S1] f32 additive mask over stream-1 keys
    mask2 = m2_ref[0]       # [1, S2] f32 additive mask over stream-2 keys

    def attend(q_src, kv_src, mask):
        # q_src:[Sq,3Hb] bf16 (Q section already scaled by 1/sqrt(hd)),
        # kv_src:[Sk,3Hb] bf16, mask:[1,Sk] f32 -> [Sq, Hb] f32 (heads merged).
        outs = []
        for h in range(nh):
            qh = q_src[:, h * hd:(h + 1) * hd]
            kh = kv_src[:, hb + h * hd:hb + (h + 1) * hd]
            vh = kv_src[:, 2 * hb + h * hd:2 * hb + (h + 1) * hd]
            s = jnp.einsum("qd,kd->qk", qh, kh,
                           preferred_element_type=jnp.float32) + mask
            m = jnp.max(s, axis=-1, keepdims=True)
            p = jnp.exp(s - m)
            l = jnp.sum(p, axis=-1, keepdims=True)
            probs = (p * pl.reciprocal(l, approx=True)).astype(jnp.bfloat16)
            outs.append(jnp.dot(probs, vh, preferred_element_type=jnp.float32))
        return jnp.concatenate(outs, axis=-1)

    # context_layer1: stream-2 queries over stream-1 keys/values
    ctx1_ref[...] = attend(qkv2, qkv1, mask1)[jnp.newaxis].astype(ctx1_ref.dtype)
    # context_layer2: stream-1 queries over stream-2 keys/values
    ctx2_ref[...] = attend(qkv1, qkv2, mask2)[jnp.newaxis].astype(ctx2_ref.dtype)


def bi_cross_attention(qkv1, qkv2, mask1, mask2, nh, hb):
    """qkv1:[B,S1,3Hb] bf16, qkv2:[B,S2,3Hb] bf16, masks:[B,1,S*] f32.

    Returns (ctx1:[B,S2,Hb] bf16, ctx2:[B,S1,Hb] bf16) with heads merged.
    """
    B, S1, _ = qkv1.shape
    S2 = qkv2.shape[1]
    hd = hb // nh
    kern = functools.partial(_biattn_kernel, nh=nh, hd=hd, hb=hb)
    return pl.pallas_call(
        kern,
        out_shape=(jax.ShapeDtypeStruct((B, S2, hb), jnp.bfloat16),
                   jax.ShapeDtypeStruct((B, S1, hb), jnp.bfloat16)),
        grid_spec=pltpu.PrefetchScalarGridSpec(
            num_scalar_prefetch=0,
            grid=(B,),
            in_specs=[
                pl.BlockSpec((1, S1, 3 * hb), lambda b: (b, 0, 0)),
                pl.BlockSpec((1, S2, 3 * hb), lambda b: (b, 0, 0)),
                pl.BlockSpec((1, 1, S1), lambda b: (b, 0, 0)),
                pl.BlockSpec((1, 1, S2), lambda b: (b, 0, 0)),
            ],
            out_specs=(pl.BlockSpec((1, S2, hb), lambda b: (b, 0, 0)),
                       pl.BlockSpec((1, S1, hb), lambda b: (b, 0, 0))),
        ),
        compiler_params=pltpu.CompilerParams(dimension_semantics=("parallel",)),
    )(qkv1, qkv2, mask1, mask2)


# --------------------------------------------------------------------------
# Kernel 3: fused per-stream tail
#   biOutput.dense + residual + LN  ->  intermediate (gelu)  ->  output + LN
# --------------------------------------------------------------------------
def _stream_tail_kernel(ctx_ref, inp_ref, wbi_ref, bbi_ref, g1_ref, b1_ref,
                        wint_ref, bint_ref, wout_ref, bout_ref, g2_ref, b2_ref,
                        o_ref):
    # BertBiOutput.denseX + residual + LayerNormX (f32 math)
    h = jnp.dot(ctx_ref[...], wbi_ref[...],
                preferred_element_type=jnp.float32) + bbi_ref[...]
    att = _layernorm(h + inp_ref[...], g1_ref[...], b1_ref[...])
    # Bert(Image)Intermediate: dense + gelu
    inter = jnp.dot(att.astype(jnp.bfloat16), wint_ref[...],
                    preferred_element_type=jnp.float32) + bint_ref[...]
    inter = _gelu(inter)
    # Bert(Image)Output: dense + residual + LayerNorm
    out = jnp.dot(inter.astype(jnp.bfloat16), wout_ref[...],
                  preferred_element_type=jnp.float32) + bout_ref[...]
    out = _layernorm(out + att, g2_ref[...], b2_ref[...])
    o_ref[...] = out.astype(o_ref.dtype)


def stream_tail(ctx2d, inp2d, wbi, bbi, g1, b1, wint, bint, wout, bout, g2, b2):
    """ctx2d:[M,Hb] bf16, inp2d:[M,Hs] f32, weights bf16 -> [M,Hs] f32."""
    M, Hb = ctx2d.shape
    Hs = wbi.shape[1]
    Hi = wint.shape[1]
    tm, mp = _row_tiling(M)
    if mp != M:
        ctx2d = jnp.pad(ctx2d, ((0, mp - M), (0, 0)))
        inp2d = jnp.pad(inp2d, ((0, mp - M), (0, 0)))
    const2 = lambda i: (0, 0)
    out = pl.pallas_call(
        _stream_tail_kernel,
        out_shape=jax.ShapeDtypeStruct((mp, Hs), jnp.float32),
        grid_spec=pltpu.PrefetchScalarGridSpec(
            num_scalar_prefetch=0,
            grid=(mp // tm,),
            in_specs=[
                pl.BlockSpec((tm, Hb), lambda i: (i, 0)),   # attention context rows (bf16)
                pl.BlockSpec((tm, Hs), lambda i: (i, 0)),   # residual input rows (f32)
                pl.BlockSpec((Hb, Hs), const2),             # biOutput dense W (bf16)
                pl.BlockSpec((1, Hs), const2),              # biOutput dense b
                pl.BlockSpec((1, Hs), const2),              # LN1 gamma
                pl.BlockSpec((1, Hs), const2),              # LN1 beta
                pl.BlockSpec((Hs, Hi), const2),             # intermediate W (bf16)
                pl.BlockSpec((1, Hi), const2),              # intermediate b
                pl.BlockSpec((Hi, Hs), const2),             # output W (bf16)
                pl.BlockSpec((1, Hs), const2),              # output b
                pl.BlockSpec((1, Hs), const2),              # LN2 gamma
                pl.BlockSpec((1, Hs), const2),              # LN2 beta
            ],
            out_specs=pl.BlockSpec((tm, Hs), lambda i: (i, 0)),
        ),
        compiler_params=pltpu.CompilerParams(dimension_semantics=("parallel",)),
    )(ctx2d, inp2d,
      wbi, bbi.reshape(1, Hs), g1.reshape(1, Hs), b1.reshape(1, Hs),
      wint, bint.reshape(1, Hi), wout, bout.reshape(1, Hs),
      g2.reshape(1, Hs), b2.reshape(1, Hs))
    return out if mp == M else out[:M]


# --------------------------------------------------------------------------
# BertConnectionLayer forward (glue in plain JAX, hot paths in Pallas)
# --------------------------------------------------------------------------
def bert_connection_layer(params, input_tensor1, attention_mask1,
                          input_tensor2, attention_mask2,
                          co_attention_mask=None, use_co_attention_mask=False):
    """Matches BertConnectionLayer.forward (visualization=False, eval mode).

    `params` must be the output of prepare_params (bf16 weights, scale folded).
    input_tensor1 : [B, S1, v_hidden]  (visual stream)
    attention_mask1: [B, S1] additive mask (0 / -10000) over visual keys
    input_tensor2 : [B, S2, hidden]    (text stream)
    attention_mask2: [B, S2] additive mask over text keys
    """
    # co_attention_mask / use_co_attention_mask accepted but unused, exactly as
    # in the reference BertBiAttention.forward body.
    del co_attention_mask, use_co_attention_mask

    B, S1, Hv = input_tensor1.shape
    _, S2, Ht = input_tensor2.shape
    Hb = params["bi_hidden"]
    nh = params["num_heads"]

    # ---- BertBiAttention: fused QKV projections (one matmul per stream) ----
    qkv1 = fused_linear(input_tensor1.reshape(B * S1, Hv),
                        params["w_qkv1"], params["b_qkv1"])        # [B*S1, 3Hb] bf16
    qkv2 = fused_linear(input_tensor2.reshape(B * S2, Ht),
                        params["w_qkv2"], params["b_qkv2"])        # [B*S2, 3Hb] bf16

    m1 = attention_mask1.reshape(B, 1, S1).astype(jnp.float32)
    m2 = attention_mask2.reshape(B, 1, S2).astype(jnp.float32)

    # Both co-attention directions in one kernel; heads split/merged in-kernel.
    ctx1, ctx2 = bi_cross_attention(qkv1.reshape(B, S1, 3 * Hb),
                                    qkv2.reshape(B, S2, 3 * Hb),
                                    m1, m2, nh, Hb)
    # ctx1: [B,S2,Hb] context_layer1 (text queries over visual keys)
    # ctx2: [B,S1,Hb] context_layer2 (visual queries over text keys)

    # ---- visual stream: biOutput.dense1/LN1 + v_intermediate + v_output ----
    layer_output1 = stream_tail(
        ctx2.reshape(B * S1, Hb), input_tensor1.reshape(B * S1, Hv),
        params["v_bi_w"], params["v_bi_b"], params["v_ln1_g"], params["v_ln1_b"],
        params["v_int_w"], params["v_int_b"], params["v_out_w"], params["v_out_b"],
        params["v_ln2_g"], params["v_ln2_b"]).reshape(B, S1, Hv)

    # ---- text stream: biOutput.dense2/LN2 + t_intermediate + t_output ----
    layer_output2 = stream_tail(
        ctx1.reshape(B * S2, Hb), input_tensor2.reshape(B * S2, Ht),
        params["t_bi_w"], params["t_bi_b"], params["t_ln1_g"], params["t_ln1_b"],
        params["t_int_w"], params["t_int_b"], params["t_out_w"], params["t_out_b"],
        params["t_ln2_g"], params["t_ln2_b"]).reshape(B, S2, Ht)

    # visualization=False -> co_attention_probs is None
    return layer_output1, layer_output2, None


# --------------------------------------------------------------------------
# pure-JAX reference for sanity checking (uses the original f32 params)
# --------------------------------------------------------------------------
def _ref_connection_layer(p, x1, mask1, x2, mask2):
    B, S1, _ = x1.shape
    _, S2, _ = x2.shape
    Hb, nh = p["bi_hidden"], p["num_heads"]
    hd = Hb // nh

    def split(x, S):
        return x.reshape(B, S, nh, hd).transpose(0, 2, 1, 3)

    qkv1 = x1 @ p["w_qkv1"] + p["b_qkv1"]
    qkv2 = x2 @ p["w_qkv2"] + p["b_qkv2"]
    q1, k1, v1 = (split(qkv1[..., i * Hb:(i + 1) * Hb], S1) for i in range(3))
    q2, k2, v2 = (split(qkv2[..., i * Hb:(i + 1) * Hb], S2) for i in range(3))

    def attn(q, k, v, mask):
        s = jnp.einsum("bhqd,bhkd->bhqk", q, k) / math.sqrt(hd)
        s = s + mask[:, None, None, :]
        pr = jax.nn.softmax(s, axis=-1)
        return jnp.einsum("bhqk,bhkd->bhqd", pr, v)

    ctx1 = attn(q2, k1, v1, mask1)
    ctx2 = attn(q1, k2, v2, mask2)
    bo1 = ctx1.transpose(0, 2, 1, 3).reshape(B, S2, Hb)
    bo2 = ctx2.transpose(0, 2, 1, 3).reshape(B, S1, Hb)

    def ln(x, g, b):
        mu = x.mean(-1, keepdims=True)
        var = ((x - mu) ** 2).mean(-1, keepdims=True)
        return (x - mu) / jnp.sqrt(var + 1e-12) * g + b

    def gelu(x):
        return x * 0.5 * (1.0 + jax.scipy.special.erf(x / jnp.sqrt(2.0)))

    def tail(ctx, inp, pre):
        att = ln(ctx @ p[pre + "_bi_w"] + p[pre + "_bi_b"] + inp,
                 p[pre + "_ln1_g"], p[pre + "_ln1_b"])
        inter = gelu(att @ p[pre + "_int_w"] + p[pre + "_int_b"])
        return ln(inter @ p[pre + "_out_w"] + p[pre + "_out_b"] + att,
                  p[pre + "_ln2_g"], p[pre + "_ln2_b"])

    return tail(bo2, x1, "v"), tail(bo1, x2, "t")


if __name__ == "__main__":
    # Small config consistent with the module:
    #   hidden_size = v_hidden_size = bi_hidden_size = 128,
    #   bi_num_attention_heads = 2 (head_dim = 64),
    #   intermediate_size = v_intermediate_size = 256,
    #   hidden_act = v_hidden_act = 'gelu', all dropouts eval-mode identity.
    B, S1, S2 = 2, 8, 16
    HV = HT = HB = 128
    NH = 2
    IV = IT = 256

    key = jax.random.PRNGKey(0)
    ks = iter(jax.random.split(key, 40))
    s = 0.02

    def nrm(shape):
        return s * jax.random.normal(next(ks), shape, jnp.float32)

    params = {
        "bi_hidden": HB,
        "num_heads": NH,
        # BertBiAttention: query/key/value weights per stream, concatenated (in,out)
        "w_qkv1": nrm((HV, 3 * HB)), "b_qkv1": nrm((3 * HB,)),
        "w_qkv2": nrm((HT, 3 * HB)), "b_qkv2": nrm((3 * HB,)),
        # visual stream: BertBiOutput.dense1/LayerNorm1 + v_intermediate + v_output
        "v_bi_w": nrm((HB, HV)), "v_bi_b": nrm((HV,)),
        "v_ln1_g": 1.0 + nrm((HV,)), "v_ln1_b": nrm((HV,)),
        "v_int_w": nrm((HV, IV)), "v_int_b": nrm((IV,)),
        "v_out_w": nrm((IV, HV)), "v_out_b": nrm((HV,)),
        "v_ln2_g": 1.0 + nrm((HV,)), "v_ln2_b": nrm((HV,)),
        # text stream: BertBiOutput.dense2/LayerNorm2 + t_intermediate + t_output
        "t_bi_w": nrm((HB, HT)), "t_bi_b": nrm((HT,)),
        "t_ln1_g": 1.0 + nrm((HT,)), "t_ln1_b": nrm((HT,)),
        "t_int_w": nrm((HT, IT)), "t_int_b": nrm((IT,)),
        "t_out_w": nrm((IT, HT)), "t_out_b": nrm((HT,)),
        "t_ln2_g": 1.0 + nrm((HT,)), "t_ln2_b": nrm((HT,)),
    }

    x1 = jax.random.normal(next(ks), (B, S1, HV), jnp.float32)   # visual stream
    x2 = jax.random.normal(next(ks), (B, S2, HT), jnp.float32)   # text stream

    # extended additive attention masks (0 = keep, -10000 = masked)
    len1 = jnp.array([S1, S1 - 2])
    len2 = jnp.array([S2, S2 - 5])
    mask1 = jnp.where(jnp.arange(S1)[None, :] < len1[:, None],
                      0.0, -10000.0).astype(jnp.float32)
    mask2 = jnp.where(jnp.arange(S2)[None, :] < len2[:, None],
                      0.0, -10000.0).astype(jnp.float32)

    dev_params = prepare_params(params)   # bf16 weights + folded attn scale, once

    out1, out2, attn_data = jax.block_until_ready(
        bert_connection_layer(dev_params, x1, mask1, x2, mask2))

    ref1, ref2 = _ref_connection_layer(params, x1, mask1, x2, mask2)

    assert out1.shape == (B, S1, HV) and out2.shape == (B, S2, HT)
    assert attn_data is None
    assert jnp.allclose(out1, ref1, atol=2e-2, rtol=2e-2), \
        float(jnp.max(jnp.abs(out1 - ref1)))
    assert jnp.allclose(out2, ref2, atol=2e-2, rtol=2e-2), \
        float(jnp.max(jnp.abs(out2 - ref2)))

    print("KERNEL_OK")
</pallas_src>

<mosaic_0001>
module attributes {stable_mosaic.version = 11 : i64} {
  func.func @_linear_kernel(%arg0: i32, %arg1: memref<16x128xf32, #tpu.memory_space<vmem>>, %arg2: memref<128x384xbf16, #tpu.memory_space<vmem>>, %arg3: memref<1x384xf32, #tpu.memory_space<vmem>>, %arg4: memref<16x384xbf16, #tpu.memory_space<vmem>>) attributes {dimension_semantics = [#tpu.dimension_semantics<parallel>], iteration_bounds = array<i64: 1>, scalar_prefetch = 0 : i64, scratch_operands = 0 : i64, tpu.core_type = #tpu.core_type<tc>, window_params = [{transform_indices = @transform_0, window_bounds = array<i64: 16, 128>}, {pipeline_mode = #tpu.pipeline_mode<synchronous>, transform_indices = @transform_1, window_bounds = array<i64: 128, 384>}, {pipeline_mode = #tpu.pipeline_mode<synchronous>, transform_indices = @transform_2, window_bounds = array<i64: 1, 384>}, {transform_indices = @transform_3, window_bounds = array<i64: 16, 384>}]} {
    %c0 = arith.constant 0 : index
    %c0_0 = arith.constant 0 : index
    %0 = vector.load %arg1[%c0, %c0_0] : memref<16x128xf32, #tpu.memory_space<vmem>>, vector<16x128xf32>
    %1 = arith.truncf %0 : vector<16x128xf32> to vector<16x128xbf16>
    %c0_1 = arith.constant 0 : index
    %c0_2 = arith.constant 0 : index
    %2 = vector.load %arg2[%c0_1, %c0_2] : memref<128x384xbf16, #tpu.memory_space<vmem>>, vector<128x384xbf16>
    %cst = arith.constant dense<0.000000e+00> : vector<16x384xf32>
    %3 = tpu.matmul %1, %2, %cst {dimension_numbers = #tpu.dot_dimension_numbers<[1], [0], [0], [1], [0, 0, 1, 1], [], []>} : vector<16x128xbf16>, vector<128x384xbf16>, vector<16x384xf32> -> vector<16x384xf32>
    %c0_3 = arith.constant 0 : index
    %c0_4 = arith.constant 0 : index
    %4 = vector.load %arg3[%c0_3, %c0_4] : memref<1x384xf32, #tpu.memory_space<vmem>>, vector<1x384xf32>
    %5 = vector.broadcast %4 : vector<1x384xf32> to vector<16x384xf32>
    %6 = arith.addf %3, %5 : vector<16x384xf32>
    %7 = arith.truncf %6 : vector<16x384xf32> to vector<16x384xbf16>
    %c0_5 = arith.constant 0 : index
    %c0_6 = arith.constant 0 : index
    %8 = vector.load %arg4[%c0_5, %c0_6] : memref<16x384xbf16, #tpu.memory_space<vmem>>, vector<16x384xbf16>
    tpu.vector_store %arg4[%c0_5, %c0_6], %7 {strides = array<i32>} : memref<16x384xbf16, #tpu.memory_space<vmem>>, vector<16x384xbf16>,
    return
  }
  func.func @transform_0(%arg0: i32) -> (i32, i32) {
    %c0_i32 = arith.constant 0 : i32
    %c0_i32_0 = arith.constant 0 : i32
    return %arg0, %c0_i32 : i32, i32
  }
  func.func @transform_1(%arg0: i32) -> (i32, i32) {
    %c0_i32 = arith.constant 0 : i32
    %c0_i32_0 = arith.constant 0 : i32
    %c0_i32_1 = arith.constant 0 : i32
    return %c0_i32, %c0_i32_0 : i32, i32
  }
  func.func @transform_2(%arg0: i32) -> (i32, i32) {
    %c0_i32 = arith.constant 0 : i32
    %c0_i32_0 = arith.constant 0 : i32
    %c0_i32_1 = arith.constant 0 : i32
    return %c0_i32, %c0_i32_0 : i32, i32
  }
  func.func @transform_3(%arg0: i32) -> (i32, i32) {
    %c0_i32 = arith.constant 0 : i32
    %c0_i32_0 = arith.constant 0 : i32
    return %arg0, %c0_i32 : i32, i32
  }
}

</mosaic_0001>

<bundles_post_ra>
// kernel: tpu_custom_call.1
= control target key start
LH: loop header
LB: loop body
LE: loop exit
PB: predicated region body
PF: predicated region fallthrough
CT: control target
= control target key end

     0   :  { %8 = vsyncpa [#allocation3], 0  ;;  %s600_s0 = inlined_call_operand.hbm [shape: f32[16,128], index: 0, kind: input, shape index: {}]   ;;  %s601_s1 = inlined_call_operand.hbm [shape: bf16[128,384], index: 1, kind: input, shape index: {}]   ;;  %s602_s2 = inlined_call_operand.vmem [shape: f32[1,384], index: 2, kind: input, shape index: {}]   ;;  %s603_s3 = inlined_call_operand.hbm [shape: bf16[16,384], index: 3, kind: output, shape index: {}]  }
   0x1   :  { %9 = vsyncpa [#allocation6], 0 }
   0x2   :  { %10 = vsyncpa [#allocation4], 0  ;;  %s525_s12 = smov [#allocation2]   ;;  %s453_s16 = scalar_lea.hbm %s600_s0, 256 }
   0x3   :  { %s16_s13 = sshll.u32 %s525_s12, 4  ;;  %p454_p0 = scmp.ne.s32.totalorder %s600_s0, %s453_s16  ;;  %s17_s13 = int_to_ptr.vmem [resolvable:$true] %s16_s13 }
   0x4   :  { %p457_p1 = scmp.lt.u32.totalorder %s453_s16, %s600_s0 }
   0x6   :  { %p459_p2 = pnand %p457_p1, %p454_p0 }
   0x8   :  { %462 = shalt.err (!%p459_p2)
}
   0x9   :  { %s463_s21 = scalar_lea.vmem %s17_s13, 256  ;;  %p468_p4 = scmp.lt.s32.totalorder %s17_s13, %s17_s13 }
   0xa   :  { %p464_p3 = scmp.ne.s32.totalorder %s17_s13, %s463_s21  ;;  %p469_p5 = scmp.lt.s32.totalorder %s463_s21, %s463_s21 }
   0xc   :  { %p470_p6 = por %p469_p5, %p468_p4 }
   0xe   :  { %p471_p7 = pnand %p470_p6, %p464_p3 }
  0x10   :  { %474 = shalt.err (!%p471_p7)
}
  0x11   :  { %s526_s22 = smov 128   ;;  %s527_s23 = smov 8  }
  0x12   :  { %22 = dma.hbm_to_vmem [thread:$0]  %s600_s0, 256, %s17_s13, [#allocation3], %s526_s22, %s526_s22, %s527_s23  }
  0x13   :  { %s528_s26 = smov [#allocation5]   ;;  %s475_s30 = scalar_lea.hbm %s601_s1, 3072 }
  0x14   :  { %s28_s27 = sshll.u32 %s528_s26, 4  ;;  %p476_p8 = scmp.ne.s32.totalorder %s601_s1, %s475_s30  ;;  %s29_s27 = int_to_ptr.vmem [resolvable:$true] %s28_s27 }
  0x15   :  { %p479_p9 = scmp.lt.u32.totalorder %s475_s30, %s601_s1 }
  0x17   :  { %p481_p10 = pnand %p479_p9, %p476_p8 }
  0x19   :  { %484 = shalt.err (!%p481_p10)
}
  0x1a   :  { %s485_s8 = scalar_lea.vmem %s29_s27, 3072  ;;  %p490_p12 = scmp.lt.s32.totalorder %s29_s27, %s29_s27 }
  0x1b   :  { %p486_p11 = scmp.ne.s32.totalorder %s29_s27, %s485_s8  ;;  %p491_p13 = scmp.lt.s32.totalorder %s485_s8, %s485_s8 }
  0x1d   :  { %p492_p0 = por %p491_p13, %p490_p12 }
  0x1f   :  { %p493_p1 = pnand %p492_p0, %p486_p11 }
  0x21   :  { %496 = shalt.err (!%p493_p1)
}
  0x22   :  { %s529_s0 = smov 192   ;;  %s530_s9 = smov 12  }
  0x23   :  { %34 = dma.hbm_to_vmem [thread:$0]  %s601_s1, 3072, %s29_s27, [#allocation6], %s529_s0, %s529_s0, %s530_s9  }
  0x24   :  { %519 = dma.done.wait [#allocation3], 256  }
  0x25   :  { %520 = vsyncadd [#allocation3], 4294967040 }
  0x26   :  { %521 = dma.done.wait [#allocation6], 3072  }
  0x27   :  { %522 = vsyncadd [#allocation6], 4294964224  ;;  %v531_v0 = vmov 0.0   ;;  %vm532_vm0 = vmmov 0   ;;  %v533_v1 = vmov 0   ;;  %v44_v25 = vld [vmem:[#allocation2] sm:$0xff]  ;;  %v81_v29 = vlaneseq }
  0x28   :  { %391 = vmatprep.subr.bf16.mxu1 %v531_v0  ;;  %407 = vmatprep.mubr.msk.bf16.mxu1 %vm532_vm0, %v531_v0  ;;  %v421_v2 = vld [vmem:[#allocation5 + $0x4] ss:$12 sps:$4 sm:$0xff]   ;;  %v423_v3 = vld [vmem:[#allocation5 + $0x8] ss:$12 sps:$4 sm:$0xff]   ;;  %v424_v4 = vld [vmem:[#allocation5] ss:$12 sps:$4 sm:$0xff]  }
  0x29   :  { %256 = vmatprep.mubr.bf16.mxu0 %v533_v1  ;;  %224 = vmatprep.subr.bf16.mxu0 %v421_v2  ;;  %v425_v5 = vld [vmem:[#allocation5 + $0x1c] ss:$12 sps:$4 sm:$0xff]   ;;  %v427_v6 = vld [vmem:[#allocation5 + $0x20] ss:$12 sps:$4 sm:$0xff]   ;;  %v428_v7 = vld [vmem:[#allocation5 + $0x18] ss:$12 sps:$4 sm:$0xff]  }
  0x2a   :  { %392 = vmatpush3.bf16.msra.mxu1 %v423_v3  ;;  %225 = vmatpush1.bf16.msra.mxu0 %v424_v4  ;;  %v429_v8 = vld [vmem:[#allocation5 + $0x34] ss:$12 sps:$4 sm:$0xff]   ;;  %v431_v9 = vld [vmem:[#allocation5 + $0x38] ss:$12 sps:$4 sm:$0xff]   ;;  %v432_v10 = vld [vmem:[#allocation5 + $0x30] ss:$12 sps:$4 sm:$0xff]  }
  0x2b   :  { %393 = vmatprep.subr.bf16.mxu1 %v531_v0  ;;  %226 = vmatprep.subr.bf16.mxu0 %v425_v5  ;;  %v433_v11 = vld [vmem:[#allocation5 + $0x4c] ss:$12 sps:$4 sm:$0xff]   ;;  %v435_v12 = vld [vmem:[#allocation5 + $0x50] ss:$12 sps:$4 sm:$0xff]   ;;  %v436_v13 = vld [vmem:[#allocation5 + $0x48] ss:$12 sps:$4 sm:$0xff]  }
  0x2c   :  { %v437_v14 = vld [vmem:[#allocation5 + $0x64] ss:$12 sps:$4 sm:$0xff]   ;;  %v439_v15 = vld [vmem:[#allocation5 + $0x68] ss:$12 sps:$4 sm:$0xff]   ;;  %v440_v16 = vld [vmem:[#allocation5 + $0x60] ss:$12 sps:$4 sm:$0xff]  }
  0x2d   :  { %v441_v17 = vld [vmem:[#allocation5 + $0x7c] ss:$12 sps:$4 sm:$0xff]   ;;  %v443_v18 = vld [vmem:[#allocation5 + $0x80] ss:$12 sps:$4 sm:$0xff]   ;;  %v444_v19 = vld [vmem:[#allocation5 + $0x78] ss:$12 sps:$4 sm:$0xff]  }
  0x2e   :  { %394 = vmatpush3.bf16.msra.mxu1 %v427_v6  ;;  %227 = vmatpush1.bf16.msra.mxu0 %v428_v7  ;;  %v445_v20 = vld [vmem:[#allocation5 + $0x94] ss:$12 sps:$4 sm:$0xff]   ;;  %v447_v21 = vld [vmem:[#allocation5 + $0x98] ss:$12 sps:$4 sm:$0xff]   ;;  %v448_v22 = vld [vmem:[#allocation5 + $0x90] ss:$12 sps:$4 sm:$0xff]  }
  0x2f   :  { %395 = vmatprep.subr.bf16.mxu1 %v531_v0  ;;  %228 = vmatprep.subr.bf16.mxu0 %v429_v8  ;;  %v449_v23 = vld [vmem:[#allocation5 + $0xac] ss:$12 sps:$4 sm:$0xff]   ;;  %v451_v24 = vld [vmem:[#allocation5 + $0xb0] ss:$12 sps:$4 sm:$0xff]   ;;  %v452_v27 = vld [vmem:[#allocation5 + $0xa8] ss:$12 sps:$4 sm:$0xff]  }
  0x30   :  { %v45_v26 = vld [vmem:[#allocation2 + $0x8] sm:$0xff]  ;;  %v82_v30 = vshrl.u32 %v81_v29, 7  ;;  %v79_v32 = vld [vmem:[%s602_s2] sm:$0x7]  ;;  %s534_s2 = smov [#allocation7]  }
  0x31   :  { %v46_v28 = vpack.c.bf16 %v45_v26, %v44_v25  ;;  %s337_s13 = sshll.u32 %s534_s2, 4  ;;  %s338_s13 = int_to_ptr.vmem [resolvable:$true] %s337_s13 }
  0x32   :  { %396 = vmatpush3.bf16.msra.mxu1 %v431_v9  ;;  %229 = vmatpush1.bf16.msra.mxu0 %v432_v10  ;;  %v91_v31 = vsub.s32 2, %v82_v30  ;;  %v83_v33 = vsub.s32 0, %v82_v30  ;;  %v87_v34 = vsub.s32 1, %v82_v30  ;;  %s497_s14 = scalar_lea.vmem %s338_s13, 384  ;;  %p502_p3 = scmp.lt.s32.totalorder %s338_s13, %s338_s13 }
  0x33   :  { %397 = vmatprep.subr.bf16.mxu1 %v531_v0  ;;  %230 = vmatprep.subr.bf16.mxu0 %v433_v11  ;;  %p498_p2 = scmp.ne.s32.totalorder %s338_s13, %s497_s14  ;;  %p503_p4 = scmp.lt.s32.totalorder %s497_s14, %s497_s14 }
  0x34   :  { %v92_v35 = vrot.slane %v79_v32, %v91_v31  ;;  %v84_v36 = vrot.slane %v79_v32, %v83_v33  ;;  %v88_v37 = vrot.slane %v79_v32, %v87_v34 }
  0x35   :  { %p504_p5 = por %p503_p4, %p502_p3 }
  0x36   :  { %398 = vmatpush3.bf16.msra.mxu1 %v435_v12  ;;  %231 = vmatpush1.bf16.msra.mxu0 %v436_v13 }
  0x37   :  { %399 = vmatprep.subr.bf16.mxu1 %v531_v0  ;;  %232 = vmatprep.subr.bf16.mxu0 %v437_v14  ;;  %p505_p6 = pnand %p504_p5, %p498_p2 }
  0x3a   :  { %400 = vmatpush3.bf16.msra.mxu1 %v439_v15  ;;  %233 = vmatpush1.bf16.msra.mxu0 %v440_v16 }
  0x3b   :  { %401 = vmatprep.subr.bf16.mxu1 %v531_v0  ;;  %234 = vmatprep.subr.bf16.mxu0 %v441_v17 }
  0x3e   :  { %402 = vmatpush3.bf16.msra.mxu1 %v443_v18  ;;  %235 = vmatpush1.bf16.msra.mxu0 %v444_v19 }
  0x3f   :  { %403 = vmatprep.subr.bf16.mxu1 %v531_v0  ;;  %236 = vmatprep.subr.bf16.mxu0 %v445_v20 }
  0x42   :  { %404 = vmatpush3.bf16.msra.mxu1 %v447_v21  ;;  %237 = vmatpush1.bf16.msra.mxu0 %v448_v22 }
  0x43   :  { %405 = vmatprep.subr.bf16.mxu1 %v531_v0  ;;  %238 = vmatprep.subr.bf16.mxu0 %v449_v23 }
  0x46   :  { %406 = vmatpush3.bf16.msra.mxu1 %v451_v24  ;;  %239 = vmatpush1.bf16.msra.mxu0 %v452_v27 }
  0x49   :  { %408 = vmatmul.mubr.bf16.vlgmr.msra.gmra.mrb[0].mxu1 %v46_v28  ;;  %257 = vmatmul.mubr.bf16.vlgmr.msra.gmra.mrb[0].mxu0 %v46_v28 }
 0x11c   :  { %v301_v38 = vpop.f32.mrb[0].mxu1  ;;  %v258_v40 = vpop.f32.mrb[0].mxu0 }
 0x11d   :  { %v302_v39 = vadd.f32 %v301_v38, %v92_v35  ;;  %v409_v41 = vpop.f32.mrb[1].mxu1  ;;  %v259_v42 = vadd.f32 %v258_v40, %v84_v36  ;;  %v260_v43 = vpop.f32.mrb[1].mxu0 }
 0x11e   :  { %v304_v44 = vpop.f32.mrb[2].mxu1  ;;  %v261_v46 = vadd.f32 %v260_v43, %v88_v37  ;;  %v262_v48 = vpop.f32.mrb[2].mxu0 }
 0x11f   :  { %v379_v45 = vpack.c.bf16 %v302_v39, %v302_v39  ;;  %v305_v47 = vadd.f32 %v304_v44, %v92_v35  ;;  %v410_v49 = vpop.f32.mrb[3].mxu1  ;;  %v263_v50 = vadd.f32 %v262_v48, %v84_v36  ;;  %v264_v51 = vpop.f32.mrb[3].mxu0 }
 0x120   :  { %v378_v52 = vpack.c.bf16 %v261_v46, %v259_v42  ;;  %v265_v54 = vadd.f32 %v264_v51, %v88_v37 }
 0x121   :  { %329 = vst [vmem:[#allocation7 + $0x8] sm:$0xf] %v379_v45  ;;  %v381_v53 = vpack.c.bf16 %v305_v47, %v305_v47 }
 0x122   :  { %328 = vst [vmem:[#allocation7] sm:$0xff] %v378_v52  ;;  %v380_v55 = vpack.c.bf16 %v265_v54, %v263_v50 }
 0x123   :  { %331 = vst [vmem:[#allocation7 + $0x14] sm:$0xf] %v381_v53 }
 0x124   :  { %330 = vst [vmem:[#allocation7 + $0xc] sm:$0xff] %v380_v55 }
 0x125   :  { %508 = shalt.err (!%p505_p6)
}
 0x126   :  { %s509_s17 = scalar_lea.hbm %s603_s3, 384 }
 0x127   :  { %p510_p7 = scmp.ne.s32.totalorder %s603_s3, %s509_s17  ;;  %p513_p8 = scmp.lt.u32.totalorder %s509_s17, %s603_s3 }
 0x129   :  { %p515_p9 = pnand %p513_p8, %p510_p7 }
 0x12b   :  { %518 = shalt.err (!%p515_p9)
}
 0x12c   :  { %343 = dma.vmem_to_hbm [thread:$0]  %s338_s13, 384, %s603_s3, [#allocation4], %s529_s0, %s529_s0, %s530_s9  }
 0x12d   :  { %523 = dma.done.wait [#allocation4], 384  }
 0x12e   :  { %524 = vsyncadd [#allocation4], 4294966912 }
 0x12f   :  { %347 = vsyncpa [#allocation3], 1 }
 0x130   :  { %348 = vsyncpa [#allocation6], 1 }
 0x131   :  { %349 = vsyncpa [#allocation4], 1 }

</bundles_post_ra>
